<compile_context>
chip_gen: v7x
topology: tpu7x:2x2x1
jax: 0.10.0
libtpu: 0.0.40
codegen_flags: <defaults>
</compile_context>

<pallas_src>
import functools

import jax
import jax.numpy as jnp
from jax.experimental import pallas as pl
from jax.experimental.pallas import tpu as pltpu


def _round_up(v, m):
    return ((v + m - 1) // m) * m


def rbfn_kernel(xa_ref, ca_ref, o_ref):
    # xa_ref: (TN, K)   augmented inputs  [x, ||x||^2, 1, zero-pad]
    # ca_ref: (K, TR)   augmented centers [w*c^T ; -0.5*w ; -0.5*w*||c||^2 ; zero-pad]
    # o_ref : (TN, TR)  output tile
    expo = jnp.dot(xa_ref[...], ca_ref[...], preferred_element_type=jnp.float32)
    # Clamp to <= 0 (equivalent to d2 >= 0) against cancellation error.
    o_ref[...] = jnp.exp(jnp.minimum(expo, 0.0))


@functools.partial(jax.jit, static_argnames=("tile_n", "tile_r"))
def rbfn_forward(x, c, logwidth, *, tile_n=1024, tile_r=1024):
    N, xdim = x.shape
    rdim, _ = c.shape

    # --- grid-invariant precomputation (hoisted to the wrapper) ------------
    x_f = x.astype(jnp.float32)
    c_f = c.astype(jnp.float32)
    w = jnp.exp(logwidth.astype(jnp.float32))           # (rdim,)
    neg_half_w = -0.5 * w                                # (rdim,)
    c2 = jnp.sum(c_f * c_f, axis=-1)                     # (rdim,)
    bias = neg_half_w * c2                               # (rdim,)

    x2 = jnp.sum(x_f * x_f, axis=-1, keepdims=True)      # (N, 1)
    ones = jnp.ones((N, 1), jnp.float32)

    k_raw = xdim + 2
    K = _round_up(k_raw, 8)                              # sublane-aligned contraction

    xa = jnp.concatenate([x_f, x2, ones], axis=-1)       # (N, k_raw)
    ca = jnp.concatenate(
        [c_f.T * w[None, :], neg_half_w[None, :], bias[None, :]], axis=0
    )                                                    # (k_raw, rdim)
    if K != k_raw:
        xa = jnp.pad(xa, ((0, 0), (0, K - k_raw)))
        ca = jnp.pad(ca, ((0, K - k_raw), (0, 0)))

    # --- tile sizing (handles small / non-divisible shapes) ----------------
    tn = min(tile_n, _round_up(N, 8))
    tr = min(tile_r, _round_up(rdim, 128))
    n_pad = _round_up(N, tn)
    r_pad = _round_up(rdim, tr)

    if n_pad != N:
        xa = jnp.pad(xa, ((0, n_pad - N), (0, 0)))
    if r_pad != rdim:
        ca = jnp.pad(ca, ((0, 0), (0, r_pad - rdim)))

    grid = (n_pad // tn, r_pad // tr)

    # --- VMEM budget: double-buffered tiles + headroom ----------------------
    tile_bytes = 4 * (tn * K + K * tr + tn * tr)
    vmem_limit = min(100 * 1024 * 1024, max(16 * 1024 * 1024, 4 * tile_bytes))

    out = pl.pallas_call(
        rbfn_kernel,
        out_shape=jax.ShapeDtypeStruct((n_pad, r_pad), jnp.float32),
        grid_spec=pltpu.PrefetchScalarGridSpec(
            num_scalar_prefetch=0,
            grid=grid,
            in_specs=[
                pl.BlockSpec((tn, K), lambda i, j: (i, 0)),   # augmented x tile
                pl.BlockSpec((K, tr), lambda i, j: (0, j)),   # augmented centers
            ],
            out_specs=pl.BlockSpec((tn, tr), lambda i, j: (i, j)),
        ),
        compiler_params=pltpu.CompilerParams(
            dimension_semantics=("parallel", "parallel"),
            vmem_limit_bytes=vmem_limit,
        ),
    )(xa, ca)

    return out[:N, :rdim]


def rbfn_ref(x, c, logwidth):
    # pure-JAX reference mirroring the PyTorch broadcast exactly
    xd = x[:, None, :] - c[None, :, :]                    # (N, rdim, xdim)
    d2 = jnp.sum(xd * xd, axis=-1)                        # (N, rdim)
    return jnp.exp(-0.5 * d2 * jnp.exp(logwidth)[None, :])


if __name__ == "__main__":
    # Small shapes consistent with the module: batch=16, xdim=16, rdim=130
    # (rdim deliberately not a multiple of 128 to exercise the padding path).
    N, xdim, rdim = 16, 16, 130

    key = jax.random.PRNGKey(0)
    kx, kc, kl = jax.random.split(key, 3)

    # Centers ~ N(0,1) (matches nn.init.normal_ default), non-trivial logwidth.
    x = jax.random.normal(kx, (N, xdim), dtype=jnp.float32)
    c = jax.random.normal(kc, (rdim, xdim), dtype=jnp.float32)
    logwidth = 0.1 * jax.random.normal(kl, (rdim,), dtype=jnp.float32)

    out = rbfn_forward(x, c, logwidth)
    out = jax.block_until_ready(out)

    ref = rbfn_ref(x, c, logwidth)
    assert out.shape == (N, rdim)
    assert jnp.allclose(out, ref, atol=1e-4, rtol=1e-4), "mismatch vs reference"

    print("KERNEL_OK")
</pallas_src>

<mosaic_0001>
module attributes {stable_mosaic.version = 11 : i64} {
  func.func @rbfn_kernel(%arg0: i32, %arg1: i32, %arg2: memref<16x24xf32, #tpu.memory_space<vmem>>, %arg3: memref<24x256xf32, #tpu.memory_space<vmem>>, %arg4: memref<16x256xf32, #tpu.memory_space<vmem>>) attributes {dimension_semantics = [#tpu.dimension_semantics<parallel>, #tpu.dimension_semantics<parallel>], iteration_bounds = array<i64: 1, 1>, scalar_prefetch = 0 : i64, scratch_operands = 0 : i64, tpu.core_type = #tpu.core_type<tc>, window_params = [{transform_indices = @transform_0, window_bounds = array<i64: 16, 24>}, {transform_indices = @transform_1, window_bounds = array<i64: 24, 256>}, {transform_indices = @transform_2, window_bounds = array<i64: 16, 256>}]} {
    %c0 = arith.constant 0 : index
    %c0_0 = arith.constant 0 : index
    %0 = vector.load %arg2[%c0, %c0_0] : memref<16x24xf32, #tpu.memory_space<vmem>>, vector<16x24xf32>
    %c0_1 = arith.constant 0 : index
    %c0_2 = arith.constant 0 : index
    %1 = vector.load %arg3[%c0_1, %c0_2] : memref<24x256xf32, #tpu.memory_space<vmem>>, vector<24x256xf32>
    %cst = arith.constant dense<0.000000e+00> : vector<16x256xf32>
    %2 = tpu.matmul %0, %1, %cst {dimension_numbers = #tpu.dot_dimension_numbers<[1], [0], [0], [1], [0, 0, 1, 1], [], []>} : vector<16x24xf32>, vector<24x256xf32>, vector<16x256xf32> -> vector<16x256xf32>
    %cst_3 = arith.constant 0.000000e+00 : f32
    %3 = vector.broadcast %cst_3 : f32 to vector<16x256xf32>
    %4 = arith.minimumf %2, %3 : vector<16x256xf32>
    %5 = math.exp %4 : vector<16x256xf32>
    %c0_4 = arith.constant 0 : index
    %c0_5 = arith.constant 0 : index
    %6 = vector.load %arg4[%c0_4, %c0_5] : memref<16x256xf32, #tpu.memory_space<vmem>>, vector<16x256xf32>
    tpu.vector_store %arg4[%c0_4, %c0_5], %5 {strides = array<i32>} : memref<16x256xf32, #tpu.memory_space<vmem>>, vector<16x256xf32>,
    return
  }
  func.func @transform_0(%arg0: i32, %arg1: i32) -> (i32, i32) {
    %c0_i32 = arith.constant 0 : i32
    %c0_i32_0 = arith.constant 0 : i32
    return %arg0, %c0_i32 : i32, i32
  }
  func.func @transform_1(%arg0: i32, %arg1: i32) -> (i32, i32) {
    %c0_i32 = arith.constant 0 : i32
    %c0_i32_0 = arith.constant 0 : i32
    return %c0_i32, %arg1 : i32, i32
  }
  func.func @transform_2(%arg0: i32, %arg1: i32) -> (i32, i32) {
    %c0_i32 = arith.constant 0 : i32
    return %arg0, %arg1 : i32, i32
  }
}

</mosaic_0001>

<bundles_post_ra>
// kernel: rbfn_forward.1
= control target key start
LH: loop header
LB: loop body
LE: loop exit
PB: predicated region body
PF: predicated region fallthrough
CT: control target
= control target key end

     0   :  { %v182_v5 = vmov 0.0   ;;  %s237_s0 = inlined_call_operand.vmem [shape: f32[16,24], index: 0, kind: input, shape index: {}]   ;;  %s238_s1 = inlined_call_operand.vmem [shape: f32[24,256], index: 1, kind: input, shape index: {}]   ;;  %s239_s2 = inlined_call_operand.hbm [shape: f32[16,256], index: 2, kind: output, shape index: {}]  }
   0x1   :  { %v15_v0 = vld [vmem:[%s238_s1 + $0x8] sm:$0xff]  ;;  %v17_v1 = vld [vmem:[%s238_s1 + $0x18] sm:$0xff]  ;;  %v14_v2 = vld [vmem:[%s238_s1] sm:$0xff]  ;;  %91 = vmatprep.mubr.f32.mxu0 %v182_v5  ;;  %97 = vmatprep.mubr.f32.mxu1 %v182_v5 }
   0x2   :  { %v138_v3 = vpack.c.bf16 %v17_v1, %v15_v0  ;;  %v16_v4 = vld [vmem:[%s238_s1 + $0x10] sm:$0xff]  ;;  %v19_v7 = vld [vmem:[%s238_s1 + $0x28] sm:$0xff] }
   0x3   :  { %v140_v6 = vpack.c.bf16 %v16_v4, %v14_v2 }
   0x4   :  { %7 = vsyncpa [#allocation3], 0  ;;  %139 = vmatprep.subr.bf16.mxu0 %v138_v3  ;;  %142 = vmatprep.subr.bf16.mxu1 %v138_v3  ;;  %v18_v8 = vld [vmem:[%s238_s1 + $0x20] sm:$0xff]  ;;  %vm20_vm0 = vcmask 195584   ;;  %v13_v10 = vld [vmem:[%s237_s0 + $0x8] sm:$0xff] }
   0x5   :  { %141 = vmatpush1.bf16.msra.mxu0 %v140_v6  ;;  %144 = vmatpush1.bf16.msra.mxu1 %v140_v6  ;;  %v12_v9 = vld [vmem:[%s237_s0] sm:$0xff]  ;;  %s183_s0 = smov [#allocation2]  }
   0x6   :  { %31 = vmatprep.subr.mxu0 %v19_v7  ;;  %143 = vmatprep.subr.mxu1 %v19_v7  ;;  %s125_s1 = sshll.u32 %s183_s0, 4  ;;  %s126_s1 = int_to_ptr.vmem [resolvable:$true] %s125_s1 }
   0x7   :  { %s158_s25 = scalar_lea.vmem %s126_s1, 512  ;;  %p163_p1 = scmp.lt.s32.totalorder %s126_s1, %s126_s1 }
   0x8   :  { %p159_p0 = scmp.ne.s32.totalorder %s126_s1, %s158_s25  ;;  %p164_p2 = scmp.lt.s32.totalorder %s158_s25, %s158_s25 }
   0x9   :  { %32 = vmatpush1.msra.mxu0 %v18_v8  ;;  %145 = vmatpush1.msra.mxu1 %v18_v8 }
   0xa   :  { %136 = vmatmul.mubr.msk.f32.vlgmr.msra.gmra.mrb[0].mxu0 %vm20_vm0, %v12_v9  ;;  %137 = vmatmul.mubr.msk.f32.vlgmr.msra.gmra.mrb[0].mxu1 %vm20_vm0, %v13_v10  ;;  %p165_p3 = por %p164_p2, %p163_p1 }
   0xc   :  { %p166_p4 = pnand %p165_p3, %p159_p0 }
  0xdd   :  { %v93_v11 = vpop.f32.mrb[0].mxu0  ;;  %v99_v12 = vpop.f32.mrb[0].mxu1 }
  0xde   :  { %v104_v13 = vmin.f32 %v93_v11, 0.0  ;;  %v106_v14 = vmin.f32 %v99_v12, 0.0  ;;  %v95_v15 = vpop.f32.mrb[1].mxu0  ;;  %v101_v16 = vpop.f32.mrb[1].mxu1 }
  0xdf   :  { %v105_v17 = vmin.f32 %v95_v15, 0.0  ;;  %v107_v18 = vmin.f32 %v101_v16, 0.0 }
  0xe0   :  { %v108_v19 = vmul.f32 1.442695, %v104_v13  ;;  %v112_v20 = vmul.f32 1.442695, %v106_v14 }
  0xe1   :  { %v110_v21 = vmul.f32 1.442695, %v105_v17  ;;  %v114_v22 = vmul.f32 1.442695, %v107_v18 }
  0xe2   :  { %150 = vpow2.f32 %v108_v19 }
  0xe3   :  { %152 = vpow2.f32 %v112_v20 }
  0xe4   :  { %154 = vpow2.f32 %v110_v21 }
  0xe5   :  { %156 = vpow2.f32 %v114_v22 }
  0xec   :  { %v151_v23 = vpop.eup %150 }
  0xed   :  { %v153_v24 = vpop.eup %152  ;;  %116 = vst [vmem:[#allocation2] sm:$0xff] %v151_v23 }
  0xee   :  { %v155_v25 = vpop.eup %154  ;;  %118 = vst [vmem:[#allocation2 + $0x10] sm:$0xff] %v153_v24 }
  0xef   :  { %v157_v26 = vpop.eup %156  ;;  %117 = vst [vmem:[#allocation2 + $0x8] sm:$0xff] %v155_v25 }
  0xf0   :  { %119 = vst [vmem:[#allocation2 + $0x18] sm:$0xff] %v157_v26 }
  0xf1   :  { %169 = shalt.err (!%p166_p4)
}
  0xf2   :  { %s170_s28 = scalar_lea.hbm %s239_s2, 512 }
  0xf3   :  { %p171_p5 = scmp.ne.s32.totalorder %s239_s2, %s170_s28  ;;  %p174_p6 = scmp.lt.u32.totalorder %s170_s28, %s239_s2 }
  0xf5   :  { %p176_p7 = pnand %p174_p6, %p171_p5 }
  0xf7   :  { %179 = shalt.err (!%p176_p7)
}
  0xf8   :  { %s184_s5 = smov 256   ;;  %s185_s6 = smov 16  }
  0xf9   :  { %131 = dma.vmem_to_hbm [thread:$0]  %s126_s1, 512, %s239_s2, [#allocation3], %s184_s5, %s184_s5, %s185_s6  }
  0xfa   :  { %180 = dma.done.wait [#allocation3], 512  }
  0xfb   :  { %181 = vsyncadd [#allocation3], 4294966784 }
  0xfc   :  { %135 = vsyncpa [#allocation3], 1 }

</bundles_post_ra>
